<compile_context>
chip_gen: v5e
topology: v5e:2x2
jax: 0.10.0
libtpu: 0.0.40
codegen_flags: <defaults>
</compile_context>

<pallas_src>
import math

import jax
import jax.numpy as jnp
from jax.experimental import pallas as pl
from jax.experimental.pallas import tpu as pltpu


def _round_up(x, m):
    return ((x + m - 1) // m) * m


def _largest_divisor_tile(padded, align, cap):
    """Largest multiple of `align` <= cap that divides `padded` (padded % align == 0)."""
    t = min(cap, padded)
    t = (t // align) * align
    while t > align and padded % t != 0:
        t -= align
    return max(t, align)


def _vmem_capacity_bytes():
    """Physical VMEM of this TPU generation; conservative (v7x-sized) fallback."""
    try:
        info = pltpu.get_tpu_info()
        v = getattr(info, "vmem_capacity_bytes", None)
        if v:
            return int(v)
    except Exception:
        pass
    return 64 << 20


# ---------------- kernel bodies ----------------

def _dense_kernel_1k_bias(x_ref, w_ref, b_ref, o_ref):
    # Full K resident in one block: no accumulator, no reduction grid axis.
    acc = jnp.dot(x_ref[...], w_ref[...], preferred_element_type=jnp.float32)
    o_ref[...] = (acc + b_ref[...]).astype(o_ref.dtype)


def _dense_kernel_1k_nobias(x_ref, w_ref, o_ref):
    o_ref[...] = jnp.dot(
        x_ref[...], w_ref[...], preferred_element_type=jnp.float32
    ).astype(o_ref.dtype)


def _dense_kernel_acc_bias(x_ref, w_ref, b_ref, o_ref, acc_ref):
    k = pl.program_id(2)

    @pl.when(k == 0)
    def _():
        acc_ref[...] = jnp.zeros_like(acc_ref)

    acc_ref[...] += jnp.dot(
        x_ref[...], w_ref[...], preferred_element_type=jnp.float32
    )

    @pl.when(k == pl.num_programs(2) - 1)
    def _():
        o_ref[...] = (acc_ref[...] + b_ref[...]).astype(o_ref.dtype)


def _dense_kernel_acc_nobias(x_ref, w_ref, o_ref, acc_ref):
    k = pl.program_id(2)

    @pl.when(k == 0)
    def _():
        acc_ref[...] = jnp.zeros_like(acc_ref)

    acc_ref[...] += jnp.dot(
        x_ref[...], w_ref[...], preferred_element_type=jnp.float32
    )

    @pl.when(k == pl.num_programs(2) - 1)
    def _():
        o_ref[...] = acc_ref[...].astype(o_ref.dtype)


# ---------------- wrapper ----------------

def dense(x, kernel, bias=None, *, tm=None, tn=None, tk=None,
          compute_dtype=None, vmem_limit_bytes=None):
    """out = x @ kernel (+ bias)."""
    M, K = x.shape
    Kw, N = kernel.shape
    assert K == Kw, "input_dim mismatch between x and kernel"
    use_bias = bias is not None
    out_dtype = x.dtype

    # Optional reduced-precision MXU path (f32 accumulation kept in-kernel).
    # NOTE: this cast is an extra HBM pass over x and the weight; for repeated
    # calls, store the weight in bf16 once and pass it in directly.
    if compute_dtype is not None:
        x = x.astype(compute_dtype)
        kernel = kernel.astype(compute_dtype)

    in_bytes = jnp.dtype(x.dtype).itemsize
    out_bytes = jnp.dtype(out_dtype).itemsize
    bias_bytes = jnp.dtype(bias.dtype).itemsize if use_bias else 0

    # ---- generation-aware tile / VMEM budgets ----
    vmem_phys = _vmem_capacity_bytes()
    big_vmem = vmem_phys >= (100 << 20)          # v5e / v6e: 128 MiB VMEM
    if big_vmem:
        cap_m, cap_n, cap_k = 512, 1024, 1024
        fastpath_bytes = 48 << 20
        ceiling = 100 << 20
    else:                                         # v7x (64 MiB) or unknown
        cap_m, cap_n, cap_k = 256, 512, 512
        fastpath_bytes = 24 << 20
        ceiling = max(min(56 << 20, vmem_phys - (8 << 20)), 16 << 20)

    # Sub-32-bit dtypes pack along sublanes: prefer 16/32-row M tiles.
    m_align = 8 if in_bytes >= 4 else (16 if in_bytes == 2 else 32)
    tm_user, tn_user = tm is not None, tn is not None

    # ---- M / N tile selection (divisor-friendly: avoid padding whenever possible) ----
    if tm is not None:
        Mp = _round_up(M, tm)
    elif M <= cap_m:
        tm, Mp = M, M                             # full-dim block: always legal, no pad
    else:
        Mp = _round_up(M, m_align)
        tm = _largest_divisor_tile(Mp, m_align, cap_m)

    if tn is not None:
        Np = _round_up(N, tn)
    elif N % 128 == 0:
        Np = N
        tn = _largest_divisor_tile(Np, 128, cap_n)
    elif N <= cap_n:
        tn, Np = N, N                             # full-dim block, no pad / no out slice
    else:
        Np = _round_up(N, 128)
        tn = _largest_divisor_tile(Np, 128, cap_n)

    # ---- dual-TensorCore parts: guarantee >=2 steps along a parallel axis ----
    if (not big_vmem) and (not tm_user) and (not tn_user):
        if (Mp // tm) * (Np // tn) == 1:
            if Np % 256 == 0:
                tn = Np // 2       # split columns: weight cols disjoint, x block reused
            elif Mp % 16 == 0:
                tm = Mp // 2

    # ---- K tile / single-K fast path ----
    if tk is not None:
        Kp = _round_up(K, tk)
        single_k = (Kp == tk)
    elif 2 * (tm * K + K * tn) * in_bytes <= fastpath_bytes:
        tk, Kp = K, K                             # all of K resident; no reduction axis
        single_k = True
    else:
        Kp = _round_up(K, 128)
        tk = _largest_divisor_tile(Kp, 128, cap_k)
        single_k = (Kp == tk)

    # ---- padding only when the chosen tiles demand it ----
    if (Mp, Kp) != (M, K):
        x = jnp.pad(x, ((0, Mp - M), (0, Kp - K)))
    if (Kp, Np) != (K, N):
        kernel = jnp.pad(kernel, ((0, Kp - K), (0, Np - N)))
    if use_bias:
        b2 = bias.reshape(1, -1)
        if Np != N:
            b2 = jnp.pad(b2, ((0, 0), (0, Np - N)))

    gm, gn = Mp // tm, Np // tn

    if single_k:
        # Grid order: keep the larger operand stationary across the inner axis so
        # Pallas skips its re-DMA (constant block index across consecutive steps).
        traffic_ij = Mp * Kp + gm * Kp * Np       # j innermost: weight re-streamed gm times
        traffic_ji = Kp * Np + gn * Mp * Kp       # i innermost: x re-streamed gn times
        if traffic_ji < traffic_ij:
            grid = (gn, gm)
            x_spec = pl.BlockSpec((tm, Kp), lambda j, i: (i, 0))
            w_spec = pl.BlockSpec((Kp, tn), lambda j, i: (0, j))
            b_spec = pl.BlockSpec((1, tn), lambda j, i: (0, j))
            o_spec = pl.BlockSpec((tm, tn), lambda j, i: (i, j))
        else:
            grid = (gm, gn)
            x_spec = pl.BlockSpec((tm, Kp), lambda i, j: (i, 0))
            w_spec = pl.BlockSpec((Kp, tn), lambda i, j: (0, j))
            b_spec = pl.BlockSpec((1, tn), lambda i, j: (0, j))
            o_spec = pl.BlockSpec((tm, tn), lambda i, j: (i, j))
        scratch = []
        dim_sem = ("parallel", "parallel")
        kernel_fn = _dense_kernel_1k_bias if use_bias else _dense_kernel_1k_nobias
    else:
        grid = (gm, gn, Kp // tk)
        x_spec = pl.BlockSpec((tm, tk), lambda i, j, k: (i, k))
        w_spec = pl.BlockSpec((tk, tn), lambda i, j, k: (k, j))
        b_spec = pl.BlockSpec((1, tn), lambda i, j, k: (0, j))
        o_spec = pl.BlockSpec((tm, tn), lambda i, j, k: (i, j))
        scratch = [pltpu.VMEM((tm, tn), jnp.float32)]
        dim_sem = ("parallel", "parallel", "arbitrary")
        kernel_fn = _dense_kernel_acc_bias if use_bias else _dense_kernel_acc_nobias

    in_specs = [x_spec, w_spec] + ([b_spec] if use_bias else [])
    operands = [x, kernel] + ([b2] if use_bias else [])

    # ---- explicit VMEM budget: double-buffered tiles + accumulator; never below est ----
    est = (2 * (tm * tk + tk * tn) * in_bytes
           + 2 * tm * tn * out_bytes
           + (2 * tn * bias_bytes if use_bias else 0)
           + (0 if single_k else tm * tn * 4))
    if vmem_limit_bytes is None:
        vmem_limit_bytes = max(est + (4 << 20), 32 << 20)
        vmem_limit_bytes = min(vmem_limit_bytes, ceiling)
        vmem_limit_bytes = max(vmem_limit_bytes, est + (1 << 20))

    cost = pl.CostEstimate(
        flops=2 * Mp * Np * Kp,
        bytes_accessed=(Mp * Kp + Kp * Np) * in_bytes + Mp * Np * out_bytes,
        transcendentals=0,
    )

    out = pl.pallas_call(
        kernel_fn,
        out_shape=jax.ShapeDtypeStruct((Mp, Np), out_dtype),
        grid_spec=pltpu.PrefetchScalarGridSpec(
            num_scalar_prefetch=0,
            grid=grid,
            in_specs=in_specs,
            out_specs=o_spec,
            scratch_shapes=scratch,
        ),
        compiler_params=pltpu.CompilerParams(
            dimension_semantics=dim_sem,
            vmem_limit_bytes=int(vmem_limit_bytes),
        ),
        cost_estimate=cost,
    )(*operands)

    if (Mp, Np) != (M, N):
        out = out[:M, :N]
    return out


def xavier_uniform(key, shape, dtype=jnp.float32):
    """Matches torch.nn.init.xavier_uniform_ for a 2D (fan_in, fan_out) tensor."""
    fan_in, fan_out = shape
    limit = math.sqrt(6.0 / (fan_in + fan_out))
    return jax.random.uniform(key, shape, dtype, minval=-limit, maxval=limit)


if __name__ == "__main__":
    key = jax.random.PRNGKey(0)
    k_x, k_w, k_x2, k_w2, k_b2 = jax.random.split(key, 5)

    # --- demo shapes consistent with the module: mm([batch, input_dim], [input_dim, output_dim]) ---
    batch = 8          # M
    input_dim = 32     # K  (input_shape[1] in the torch module)
    output_dim = 16    # N

    x = jax.random.normal(k_x, (batch, input_dim), dtype=jnp.float32)
    kernel = xavier_uniform(k_w, (input_dim, output_dim))
    bias = jnp.zeros((output_dim,), dtype=jnp.float32)   # zeros_ init

    out = dense(x, kernel, bias)          # single-K fast path, full-dim blocks, no padding
    jax.block_until_ready(out)
    ref = x @ kernel + bias
    assert out.shape == (batch, output_dim)
    assert jnp.allclose(out, ref, atol=1e-5, rtol=1e-5)

    # --- multi-K accumulator path (forced small tk) ---
    M2, K2, N2 = 64, 256, 192
    x2 = jax.random.normal(k_x2, (M2, K2), dtype=jnp.float32)
    w2 = xavier_uniform(k_w2, (K2, N2))
    b2 = jax.random.normal(k_b2, (N2,), dtype=jnp.float32)
    out2 = dense(x2, w2, b2, tk=128)      # reduction grid axis with f32 VMEM accumulator
    jax.block_until_ready(out2)
    ref2 = x2 @ w2 + b2
    assert jnp.allclose(out2, ref2, atol=1e-4, rtol=1e-5)

    # --- use_bias=False path ---
    out3 = dense(x2, w2, None)
    jax.block_until_ready(out3)
    assert jnp.allclose(out3, x2 @ w2, atol=1e-4, rtol=1e-5)

    # --- bf16 MXU path (f32 accumulation; looser tolerance vs torch f32 semantics) ---
    out4 = dense(x2, w2, b2, compute_dtype=jnp.bfloat16)
    jax.block_until_ready(out4)
    assert float(jnp.max(jnp.abs(out4 - ref2))) < 0.15

    print("KERNEL_OK")
</pallas_src>

<mosaic_0001>
module attributes {stable_mosaic.version = 11 : i64} {
  func.func @_dense_kernel_1k_bias(%arg0: i32, %arg1: i32, %arg2: memref<8x32xf32, #tpu.memory_space<vmem>>, %arg3: memref<32x16xf32, #tpu.memory_space<vmem>>, %arg4: memref<1x16xf32, #tpu.memory_space<vmem>>, %arg5: memref<8x16xf32, #tpu.memory_space<vmem>>) attributes {dimension_semantics = [#tpu.dimension_semantics<parallel>, #tpu.dimension_semantics<parallel>], iteration_bounds = array<i64: 1, 1>, scalar_prefetch = 0 : i64, scratch_operands = 0 : i64, tpu.core_type = #tpu.core_type<tc>, window_params = [{transform_indices = @transform_0, window_bounds = array<i64: 8, 32>}, {transform_indices = @transform_1, window_bounds = array<i64: 32, 16>}, {transform_indices = @transform_2, window_bounds = array<i64: 1, 16>}, {transform_indices = @transform_3, window_bounds = array<i64: 8, 16>}]} {
    %c0 = arith.constant 0 : index
    %c0_0 = arith.constant 0 : index
    %0 = vector.load %arg2[%c0, %c0_0] : memref<8x32xf32, #tpu.memory_space<vmem>>, vector<8x32xf32>
    %c0_1 = arith.constant 0 : index
    %c0_2 = arith.constant 0 : index
    %1 = vector.load %arg3[%c0_1, %c0_2] : memref<32x16xf32, #tpu.memory_space<vmem>>, vector<32x16xf32>
    %cst = arith.constant dense<0.000000e+00> : vector<8x16xf32>
    %2 = tpu.matmul %0, %1, %cst {dimension_numbers = #tpu.dot_dimension_numbers<[1], [0], [0], [1], [0, 0, 1, 1], [], []>} : vector<8x32xf32>, vector<32x16xf32>, vector<8x16xf32> -> vector<8x16xf32>
    %c0_3 = arith.constant 0 : index
    %c0_4 = arith.constant 0 : index
    %3 = vector.load %arg4[%c0_3, %c0_4] : memref<1x16xf32, #tpu.memory_space<vmem>>, vector<1x16xf32>
    %4 = vector.broadcast %3 : vector<1x16xf32> to vector<8x16xf32>
    %5 = arith.addf %2, %4 : vector<8x16xf32>
    %c0_5 = arith.constant 0 : index
    %c0_6 = arith.constant 0 : index
    %6 = vector.load %arg5[%c0_5, %c0_6] : memref<8x16xf32, #tpu.memory_space<vmem>>, vector<8x16xf32>
    tpu.vector_store %arg5[%c0_5, %c0_6], %5 {strides = array<i32>} : memref<8x16xf32, #tpu.memory_space<vmem>>, vector<8x16xf32>,
    return
  }
  func.func @transform_0(%arg0: i32, %arg1: i32) -> (i32, i32) {
    %c0_i32 = arith.constant 0 : i32
    %c0_i32_0 = arith.constant 0 : i32
    return %arg0, %c0_i32 : i32, i32
  }
  func.func @transform_1(%arg0: i32, %arg1: i32) -> (i32, i32) {
    %c0_i32 = arith.constant 0 : i32
    %c0_i32_0 = arith.constant 0 : i32
    return %c0_i32, %arg1 : i32, i32
  }
  func.func @transform_2(%arg0: i32, %arg1: i32) -> (i32, i32) {
    %c0_i32 = arith.constant 0 : i32
    %c0_i32_0 = arith.constant 0 : i32
    return %c0_i32, %arg1 : i32, i32
  }
  func.func @transform_3(%arg0: i32, %arg1: i32) -> (i32, i32) {
    %c0_i32 = arith.constant 0 : i32
    return %arg0, %arg1 : i32, i32
  }
}

</mosaic_0001>

<bundles_post_ra>
// kernel: tpu_custom_call.1
= control target key start
LH: loop header
LB: loop body
LE: loop exit
PB: predicated region body
PF: predicated region fallthrough
CT: control target
= control target key end

     0   :  { %s137_s0 = inlined_call_operand.vmem [shape: f32[8,32], index: 0, kind: input, shape index: {}]   ;;  %s138_s1 = inlined_call_operand.vmem [shape: f32[32,16], index: 1, kind: input, shape index: {}]   ;;  %s139_s2 = inlined_call_operand.vmem [shape: f32[1,16], index: 2, kind: input, shape index: {}]   ;;  %s140_s3 = inlined_call_operand.hbm [shape: f32[8,16], index: 3, kind: output, shape index: {}]  }
   0x1   :  { %v19_v0 = vld [vmem:[%s138_s1 + $0x18] sm:$0xff]  ;;  %v18_v1 = vld [vmem:[%s138_s1 + $0x10] sm:$0xff]  ;;  %v17_v2 = vld [vmem:[%s138_s1 + $0x8] sm:$0xff] }
   0x2   :  { %40 = vmatpush.msra.mxu0 %v19_v0 }
   0x3   :  { %8 = vsyncpa [#allocation3], 0  ;;  %v16_v3 = vld [vmem:[%s138_s1] sm:$0xff]  ;;  %vm24_vm0 = vcmask 261120   ;;  %s95_s24 = smov [#allocation2]   ;;  %s57_s28 = sshll.u32 %s140_s3, 4  ;;  %s58_s28 = int_to_ptr.hbm [resolvable:$true] %s57_s28 }
   0x4   :  { %41 = vmatpush.msra.mxu0 %v18_v1  ;;  %v15_v4 = vld [vmem:[%s137_s0] sm:$0xff]  ;;  %s55_s25 = sshll.u32 %s95_s24, 4  ;;  %vm48_vm1 = vcmask 130048   ;;  %s56_s25 = int_to_ptr.vmem [resolvable:$true] %s55_s25 }
   0x5   :  { %v68_v5 = vld [vmem:[%s139_s2] ss:$0 sm:$0xff] }
   0x6   :  { %42 = vmatpush.msra.mxu0 %v17_v2 }
   0x8   :  { %43 = vmatpush.msra.mxu0 %v16_v3 }
   0x9   :  { %66 = vmatmul.msk.f32.vlgmr.msra.gmra.mxu0 %vm24_vm0, %v15_v4 }
  0x86   :  { %v45_v6 = vpop.f32.mrf.mxu0 }
  0x87   :  { %v46_v7 = vadd.f32 %v68_v5, %v45_v6 }
  0x89   :  { %49 = vst.msk [vmem:[#allocation2] sm:$0xff] %vm48_vm1, %v46_v7 }
  0x8a   :  { %60 = dma.vmem_to_hbm [thread:$0]  %s56_s25, 128, %s58_s28, [#allocation3]  }
  0x8b   :  { %93 = dma.done.wait [#allocation3], 128  }
  0x8c   :  { %94 = vsyncadd [#allocation3], 4294967168 }
  0x8d   :  { %65 = vsyncpa [#allocation3], 1 }

</bundles_post_ra>
